<compile_context>
chip_gen: v7x
topology: tpu7x:2x2x1
jax: 0.10.0
libtpu: 0.0.40
codegen_flags: <defaults>
</compile_context>

<pallas_src>
import jax
import jax.numpy as jnp
from jax.experimental import pallas as pl
from jax.experimental.pallas import tpu as pltpu

IN_FEATURES = 8
HIDDEN = 64
HIDDEN_PAD = 128   # lane-dense padded hidden dim (zero columns contribute exactly 0)
OUT_FEATURES = 100


def _generator_kernel(x_ref, w1_ref, b1_ref, w2_ref, b2_ref, out_ref):
    # Layer 1: (TB, 8) @ (8, 128) + (1, 128)   [hidden zero-padded 64 -> 128]
    h = jnp.dot(x_ref[...], w1_ref[...], preferred_element_type=jnp.float32)
    h = h + b1_ref[...]
    # LeakyReLU(negative_slope=0.02)
    h = jnp.where(h >= 0.0, h, 0.02 * h)
    # Layer 2: (TB, 128) @ (128, 100) + (1, 100)  -> write 100 lanes directly
    y = jnp.dot(h, w2_ref[...], preferred_element_type=jnp.float32)
    y = y + b2_ref[...]
    # Sigmoid (exp on EUP), exact divide (kernel is HBM-bound, not VALU-bound)
    out_ref[...] = jax.nn.sigmoid(y).astype(out_ref.dtype)


def prepare_generator_params(w1, b1, w2, b2):
    """Pad params to kernel layout ONCE (call at init, not per forward).

    w1: (8, 64), b1: (64,) or (1, 64), w2: (64, 100), b2: (100,) or (1, 100).
    Returns (w1p, b1p, w2p, b2p) with hidden dim zero-padded 64 -> 128.
    """
    w1p = jnp.zeros((IN_FEATURES, HIDDEN_PAD), jnp.float32).at[:, :HIDDEN].set(w1)
    b1p = jnp.zeros((1, HIDDEN_PAD), jnp.float32).at[:, :HIDDEN].set(
        jnp.reshape(b1, (1, HIDDEN)))
    w2p = jnp.zeros((HIDDEN_PAD, OUT_FEATURES), jnp.float32).at[:HIDDEN, :].set(w2)
    b2p = jnp.reshape(b2, (1, OUT_FEATURES)).astype(jnp.float32)
    return w1p, b1p, w2p, b2p


def generator_forward(x, w1p, b1p, w2p, b2p, *, block_b=4096):
    """x: (B, 8) float32 -> (B, 100) float32.  Params must come from
    prepare_generator_params (padded layout, computed once at init)."""
    B = x.shape[0]

    # --- batch tiling ---------------------------------------------------
    b_pad8 = pl.cdiv(B, 8) * 8
    tb = min(block_b, b_pad8)
    # Keep >=2 grid steps when the batch allows it, so the "parallel" batch
    # axis can shard across v7x's 2 TensorCores.
    if b_pad8 >= 16 and tb >= b_pad8:
        tb = pl.cdiv(b_pad8 // 2, 8) * 8
    b_padded = pl.cdiv(b_pad8, tb) * tb
    if b_padded != B:
        x = jnp.pad(x, ((0, b_padded - B), (0, 0)))   # tail rows only
    grid = (b_padded // tb,)

    # --- VMEM budget (explicit, per review) ------------------------------
    # A (tb, 8) f32 x-block and a (tb, 100) out-block are both lane-padded to
    # 128 lanes in VMEM -> tb*128*4 bytes per buffer; double-buffered each.
    vmem_limit = int(4 * tb * 128 * 4            # 2x x + 2x out buffers
                     + 2 * (w1p.size + b1p.size + w2p.size + b2p.size) * 4
                     + (4 << 20))                # headroom
    vmem_limit = min(vmem_limit, 60 << 20)       # stay under v7x 64 MiB physical

    flops = 2 * b_padded * (IN_FEATURES * HIDDEN_PAD + HIDDEN_PAD * OUT_FEATURES)
    bytes_accessed = 4 * (b_padded * (IN_FEATURES + OUT_FEATURES)
                          + w1p.size + b1p.size + w2p.size + b2p.size)
    cost = pl.CostEstimate(flops=flops,
                           transcendentals=b_padded * OUT_FEATURES,
                           bytes_accessed=bytes_accessed)

    out = pl.pallas_call(
        _generator_kernel,
        out_shape=jax.ShapeDtypeStruct((b_padded, OUT_FEATURES), jnp.float32),
        grid=grid,
        in_specs=[
            pl.BlockSpec((tb, IN_FEATURES), lambda i: (i, 0)),            # x tile
            pl.BlockSpec((IN_FEATURES, HIDDEN_PAD), lambda i: (0, 0)),    # w1 (resident)
            pl.BlockSpec((1, HIDDEN_PAD), lambda i: (0, 0)),              # b1 (resident)
            pl.BlockSpec((HIDDEN_PAD, OUT_FEATURES), lambda i: (0, 0)),   # w2 (resident)
            pl.BlockSpec((1, OUT_FEATURES), lambda i: (0, 0)),            # b2 (resident)
        ],
        out_specs=pl.BlockSpec((tb, OUT_FEATURES), lambda i: (i, 0)),
        compiler_params=pltpu.CompilerParams(
            dimension_semantics=("parallel",),
            vmem_limit_bytes=vmem_limit,
        ),
        cost_estimate=cost,
    )(x, w1p, b1p, w2p, b2p)

    # Row slice only (no-op when B is already a multiple of the tile).
    return out if b_padded == B else out[:B]


def init_generator_params(key):
    """Deterministic init mimicking PyTorch nn.Linear default:
    U(-1/sqrt(fan_in), 1/sqrt(fan_in)) for weights and biases."""
    k1, k2, k3, k4 = jax.random.split(key, 4)
    bound1 = 1.0 / jnp.sqrt(8.0)
    bound2 = 1.0 / jnp.sqrt(64.0)
    # stored as (in_features, out_features)
    w1 = jax.random.uniform(k1, (IN_FEATURES, HIDDEN), jnp.float32, -bound1, bound1)
    b1 = jax.random.uniform(k2, (1, HIDDEN), jnp.float32, -bound1, bound1)
    w2 = jax.random.uniform(k3, (HIDDEN, OUT_FEATURES), jnp.float32, -bound2, bound2)
    b2 = jax.random.uniform(k4, (1, OUT_FEATURES), jnp.float32, -bound2, bound2)
    return w1, b1, w2, b2


def _reference_forward(x, w1, b1, w2, b2):
    h = x @ w1 + b1
    h = jnp.where(h >= 0.0, h, 0.02 * h)
    y = h @ w2 + b2
    return jax.nn.sigmoid(y)


if __name__ == "__main__":
    key = jax.random.PRNGKey(0)
    kx, kp = jax.random.split(key)

    B = 8  # small demo batch; wrapper tiles arbitrary B with TB up to 4096
    x = jax.random.normal(kx, (B, IN_FEATURES), jnp.float32)
    w1, b1, w2, b2 = init_generator_params(kp)

    # Pad once at init (hoisted out of the per-call hot path).
    w1p, b1p, w2p, b2p = prepare_generator_params(w1, b1, w2, b2)

    out = generator_forward(x, w1p, b1p, w2p, b2p)
    out = jax.block_until_ready(out)

    # correctness check against pure-JAX reference
    ref = _reference_forward(x, w1, b1, w2, b2)
    assert out.shape == (B, OUT_FEATURES)
    assert jnp.allclose(out, ref, atol=1e-5, rtol=1e-5)

    print("KERNEL_OK")
</pallas_src>

<mosaic_0001>
module attributes {stable_mosaic.version = 11 : i64} {
  func.func @_generator_kernel(%arg0: i32, %arg1: memref<8x8xf32, #tpu.memory_space<vmem>>, %arg2: memref<8x128xf32, #tpu.memory_space<vmem>>, %arg3: memref<1x128xf32, #tpu.memory_space<vmem>>, %arg4: memref<128x100xf32, #tpu.memory_space<vmem>>, %arg5: memref<1x100xf32, #tpu.memory_space<vmem>>, %arg6: memref<8x100xf32, #tpu.memory_space<vmem>>) attributes {dimension_semantics = [#tpu.dimension_semantics<parallel>], iteration_bounds = array<i64: 1>, scalar_prefetch = 0 : i64, scratch_operands = 0 : i64, tpu.core_type = #tpu.core_type<tc>, window_params = [{transform_indices = @transform_0, window_bounds = array<i64: 8, 8>}, {pipeline_mode = #tpu.pipeline_mode<synchronous>, transform_indices = @transform_1, window_bounds = array<i64: 8, 128>}, {pipeline_mode = #tpu.pipeline_mode<synchronous>, transform_indices = @transform_2, window_bounds = array<i64: 1, 128>}, {pipeline_mode = #tpu.pipeline_mode<synchronous>, transform_indices = @transform_3, window_bounds = array<i64: 128, 100>}, {pipeline_mode = #tpu.pipeline_mode<synchronous>, transform_indices = @transform_4, window_bounds = array<i64: 1, 100>}, {transform_indices = @transform_5, window_bounds = array<i64: 8, 100>}]} {
    %c0 = arith.constant 0 : index
    %c0_0 = arith.constant 0 : index
    %0 = vector.load %arg1[%c0, %c0_0] : memref<8x8xf32, #tpu.memory_space<vmem>>, vector<8x8xf32>
    %c0_1 = arith.constant 0 : index
    %c0_2 = arith.constant 0 : index
    %1 = vector.load %arg2[%c0_1, %c0_2] : memref<8x128xf32, #tpu.memory_space<vmem>>, vector<8x128xf32>
    %cst = arith.constant dense<0.000000e+00> : vector<8x128xf32>
    %2 = tpu.matmul %0, %1, %cst {dimension_numbers = #tpu.dot_dimension_numbers<[1], [0], [0], [1], [0, 0, 1, 1], [], []>} : vector<8x8xf32>, vector<8x128xf32>, vector<8x128xf32> -> vector<8x128xf32>
    %c0_3 = arith.constant 0 : index
    %c0_4 = arith.constant 0 : index
    %3 = vector.load %arg3[%c0_3, %c0_4] : memref<1x128xf32, #tpu.memory_space<vmem>>, vector<1x128xf32>
    %4 = vector.broadcast %3 : vector<1x128xf32> to vector<8x128xf32>
    %5 = arith.addf %2, %4 : vector<8x128xf32>
    %cst_5 = arith.constant 0.000000e+00 : f32
    %6 = vector.broadcast %cst_5 : f32 to vector<8x128xf32>
    %7 = arith.cmpf oge, %5, %6 : vector<8x128xf32>
    %cst_6 = arith.constant 2.000000e-02 : f32
    %8 = vector.broadcast %cst_6 : f32 to vector<8x128xf32>
    %9 = arith.mulf %8, %5 : vector<8x128xf32>
    %10 = arith.select %7, %5, %9 : vector<8x128xi1>, vector<8x128xf32>
    %c0_7 = arith.constant 0 : index
    %c0_8 = arith.constant 0 : index
    %11 = vector.load %arg4[%c0_7, %c0_8] : memref<128x100xf32, #tpu.memory_space<vmem>>, vector<128x100xf32>
    %cst_9 = arith.constant dense<0.000000e+00> : vector<8x100xf32>
    %12 = tpu.matmul %10, %11, %cst_9 {dimension_numbers = #tpu.dot_dimension_numbers<[1], [0], [0], [1], [0, 0, 1, 1], [], []>} : vector<8x128xf32>, vector<128x100xf32>, vector<8x100xf32> -> vector<8x100xf32>
    %c0_10 = arith.constant 0 : index
    %c0_11 = arith.constant 0 : index
    %13 = vector.load %arg5[%c0_10, %c0_11] : memref<1x100xf32, #tpu.memory_space<vmem>>, vector<1x100xf32>
    %14 = vector.broadcast %13 : vector<1x100xf32> to vector<8x100xf32>
    %15 = arith.addf %12, %14 : vector<8x100xf32>
    %16 = arith.negf %15 : vector<8x100xf32>
    %17 = math.exp %16 : vector<8x100xf32>
    %cst_12 = arith.constant 1.000000e+00 : f32
    %18 = vector.broadcast %cst_12 : f32 to vector<8x100xf32>
    %19 = arith.addf %18, %17 : vector<8x100xf32>
    %20 = arith.divf %18, %19 : vector<8x100xf32>
    %c0_13 = arith.constant 0 : index
    %c0_14 = arith.constant 0 : index
    %21 = vector.load %arg6[%c0_13, %c0_14] : memref<8x100xf32, #tpu.memory_space<vmem>>, vector<8x100xf32>
    tpu.vector_store %arg6[%c0_13, %c0_14], %20 {strides = array<i32>} : memref<8x100xf32, #tpu.memory_space<vmem>>, vector<8x100xf32>,
    return
  }
  func.func @transform_0(%arg0: i32) -> (i32, i32) {
    %c0_i32 = arith.constant 0 : i32
    %c0_i32_0 = arith.constant 0 : i32
    return %arg0, %c0_i32 : i32, i32
  }
  func.func @transform_1(%arg0: i32) -> (i32, i32) {
    %c0_i32 = arith.constant 0 : i32
    %c0_i32_0 = arith.constant 0 : i32
    %c0_i32_1 = arith.constant 0 : i32
    return %c0_i32, %c0_i32_0 : i32, i32
  }
  func.func @transform_2(%arg0: i32) -> (i32, i32) {
    %c0_i32 = arith.constant 0 : i32
    %c0_i32_0 = arith.constant 0 : i32
    %c0_i32_1 = arith.constant 0 : i32
    return %c0_i32, %c0_i32_0 : i32, i32
  }
  func.func @transform_3(%arg0: i32) -> (i32, i32) {
    %c0_i32 = arith.constant 0 : i32
    %c0_i32_0 = arith.constant 0 : i32
    %c0_i32_1 = arith.constant 0 : i32
    return %c0_i32, %c0_i32_0 : i32, i32
  }
  func.func @transform_4(%arg0: i32) -> (i32, i32) {
    %c0_i32 = arith.constant 0 : i32
    %c0_i32_0 = arith.constant 0 : i32
    %c0_i32_1 = arith.constant 0 : i32
    return %c0_i32, %c0_i32_0 : i32, i32
  }
  func.func @transform_5(%arg0: i32) -> (i32, i32) {
    %c0_i32 = arith.constant 0 : i32
    %c0_i32_0 = arith.constant 0 : i32
    return %arg0, %c0_i32 : i32, i32
  }
}

</mosaic_0001>

<bundles_post_ra>
// kernel: tpu_custom_call.1
= control target key start
LH: loop header
LB: loop body
LE: loop exit
PB: predicated region body
PF: predicated region fallthrough
CT: control target
= control target key end

     0   :  { %vm30_vm0 = vcmask 64512   ;;  %v341_v2 = vmov 0.0   ;;  %vm342_vm1 = vmmov 0   ;;  %v343_v6 = vmov 0.0|0.0   ;;  %s447_s0 = inlined_call_operand.vmem [shape: f32[8,8], index: 0, kind: input, shape index: {}]   ;;  %s448_s1 = inlined_call_operand.vmem [shape: f32[8,128], index: 1, kind: input, shape index: {}]   ;;  %s449_s2 = inlined_call_operand.vmem [shape: f32[1,128], index: 2, kind: input, shape index: {}]   ;;  %s450_s3 = inlined_call_operand.vmem [shape: f32[128,100], index: 3, kind: input, shape index: {}]   ;;  %s451_s4 = inlined_call_operand.vmem [shape: f32[1,100], index: 4, kind: input, shape index: {}]   ;;  %s452_s5 = inlined_call_operand.hbm [shape: f32[8,100], index: 5, kind: output, shape index: {}]  }
   0x1   :  { %v22_v0 = vld [vmem:[%s448_s1] sm:$0xff]  ;;  %245 = vmatprep.subr.mxu0 %v341_v2  ;;  %247 = vmatprep.mubr.msk.f32.mxu0 %vm342_vm1, %v341_v2  ;;  %v108_v4 = vld [vmem:[%s450_s3 + $0x8] sm:$0xff]  ;;  %v109_v5 = vld [vmem:[%s450_s3 + $0x10] sm:$0xff] }
   0x2   :  { %v21_v1 = vld [vmem:[%s447_s0] sm:$0xff]  ;;  %246 = vmatpush3.msra.mxu0 %v22_v0  ;;  %285 = vmatprep.subr.bf16.mxu1 %v343_v6  ;;  %v110_v8 = vld [vmem:[%s450_s3 + $0x18] sm:$0xff]  ;;  %v112_v11 = vld [vmem:[%s450_s3 + $0x28] sm:$0xff] }
   0x3   :  { %v107_v3 = vld [vmem:[%s450_s3] sm:$0xff]  ;;  %248 = vmatmul.mubr.msk.f32.vlgmr.msra.gmra.mrb[0].mxu0 %vm30_vm0, %v21_v1  ;;  %282 = vmatprep.mubr.msk.f32.mxu1 %vm342_vm1, %v341_v2  ;;  %v289_v9 = vpack.c.bf16 %v110_v8, %v109_v5 }
   0x4   :  { %v286_v7 = vpack.c.bf16 %v108_v4, %v107_v3  ;;  %v111_v10 = vld [vmem:[%s450_s3 + $0x20] sm:$0xff] }
   0x6   :  { %287 = vmatpush3.bf16.msra.mxu1 %v286_v7 }
   0x7   :  { %288 = vmatprep.subr.bf16.mxu1 %v343_v6 }
   0x8   :  { %10 = vsyncpa [#allocation3], 0  ;;  %v292_v12 = vpack.c.bf16 %v112_v11, %v111_v10  ;;  %v113_v13 = vld [vmem:[%s450_s3 + $0x30] sm:$0xff]  ;;  %v114_v14 = vld [vmem:[%s450_s3 + $0x38] sm:$0xff]  ;;  %vm206_vm3 = vcmask 818176  }
   0x9   :  { %v295_v15 = vpack.c.bf16 %v114_v14, %v113_v13  ;;  %v115_v16 = vld [vmem:[%s450_s3 + $0x40] sm:$0xff]  ;;  %v116_v17 = vld [vmem:[%s450_s3 + $0x48] sm:$0xff]  ;;  %v117_v19 = vld [vmem:[%s450_s3 + $0x50] sm:$0xff] }
   0xa   :  { %290 = vmatpush3.bf16.msra.mxu1 %v289_v9  ;;  %v298_v18 = vpack.c.bf16 %v116_v17, %v115_v16  ;;  %v118_v20 = vld [vmem:[%s450_s3 + $0x58] sm:$0xff]  ;;  %v119_v22 = vld [vmem:[%s450_s3 + $0x60] sm:$0xff]  ;;  %v120_v23 = vld [vmem:[%s450_s3 + $0x68] sm:$0xff] }
   0xb   :  { %291 = vmatprep.subr.bf16.mxu1 %v343_v6  ;;  %v301_v21 = vpack.c.bf16 %v118_v20, %v117_v19  ;;  %v304_v24 = vpack.c.bf16 %v120_v23, %v119_v22  ;;  %v121_v25 = vld [vmem:[%s450_s3 + $0x70] sm:$0xff]  ;;  %v122_v26 = vld [vmem:[%s450_s3 + $0x78] sm:$0xff]  ;;  %v222_v28 = vld [vmem:[%s449_s2] ss:$0 sm:$0xff]  ;;  %s344_s2 = smov [#allocation2]  }
   0xc   :  { %v307_v27 = vpack.c.bf16 %v122_v26, %v121_v25  ;;  %v224_v34 = vld [vmem:[%s451_s4] ss:$0 sm:$0xff]  ;;  %s214_s3 = sshll.u32 %s344_s2, 4  ;;  %s215_s3 = int_to_ptr.vmem [resolvable:$true] %s214_s3 }
   0xd   :  { %s317_s29 = scalar_lea.vmem %s215_s3, 128  ;;  %p322_p1 = scmp.lt.s32.totalorder %s215_s3, %s215_s3 }
   0xe   :  { %293 = vmatpush3.bf16.msra.mxu1 %v292_v12  ;;  %p318_p0 = scmp.ne.s32.totalorder %s215_s3, %s317_s29  ;;  %p323_p2 = scmp.lt.s32.totalorder %s317_s29, %s317_s29 }
   0xf   :  { %294 = vmatprep.subr.bf16.mxu1 %v343_v6 }
  0x10   :  { %p324_p3 = por %p323_p2, %p322_p1 }
  0x12   :  { %296 = vmatpush3.bf16.msra.mxu1 %v295_v15  ;;  %p325_p4 = pnand %p324_p3, %p318_p0 }
  0x13   :  { %297 = vmatprep.subr.bf16.mxu1 %v343_v6 }
  0x16   :  { %299 = vmatpush3.bf16.msra.mxu1 %v298_v18 }
  0x17   :  { %300 = vmatprep.subr.bf16.mxu1 %v343_v6 }
  0x1a   :  { %302 = vmatpush3.bf16.msra.mxu1 %v301_v21 }
  0x1b   :  { %303 = vmatprep.subr.bf16.mxu1 %v343_v6 }
  0x1e   :  { %305 = vmatpush3.bf16.msra.mxu1 %v304_v24 }
  0x1f   :  { %306 = vmatprep.subr.bf16.mxu1 %v343_v6 }
  0x22   :  { %308 = vmatpush3.bf16.msra.mxu1 %v307_v27 }
  0xd6   :  { %v100_v29 = vpop.f32.mrb[0].mxu0 }
  0xd7   :  { %v101_v30 = vadd.f32 %v222_v28, %v100_v29  ;;  %v249_v31 = vpop.f32.mrb[1].mxu0 }
  0xd9   :  { %v105_v32 = vmul.f32 0.02, %v101_v30  ;;  %vm104_vm2 = vcmp.ge.f32.partialorder %v101_v30, 0.0 }
  0xdb   :  { %v106_v33 = vsel %vm104_vm2, %v101_v30, %v105_v32 }
  0xdc   :  { %283 = vmatmul.mubr.f32.vlgmr.msra.gmra.mrb[0].mxu1 %v106_v33 }
 0x1af   :  { %v196_v35 = vpop.f32.mrb[0].mxu1 }
 0x1b0   :  { %v197_v36 = vadd.f32 %v224_v34, %v196_v35  ;;  %v284_v37 = vpop.f32.mrb[1].mxu1 }
 0x1b2   :  { %v225_v38 = vmul.f32 -1.442695, %v197_v36 }
 0x1b4   :  { %313 = vpow2.f32 %v225_v38 }
 0x1be   :  { %v314_v39 = vpop.eup %313 }
 0x1bf   :  { %v203_v40 = vadd.f32 1.0, %v314_v39 }
 0x1c1   :  { %315 = vrcp.f32 %v203_v40 }
 0x1cb   :  { %v316_v41 = vpop.eup %315 }
 0x1cc   :  { %207 = vst.msk [vmem:[#allocation2] sm:$0xff] %vm206_vm3, %v316_v41 }
 0x1cd   :  { %328 = shalt.err (!%p325_p4)
}
 0x1ce   :  { %s329_s6 = scalar_lea.hbm %s452_s5, 128 }
 0x1cf   :  { %p330_p5 = scmp.ne.s32.totalorder %s452_s5, %s329_s6  ;;  %p333_p6 = scmp.lt.u32.totalorder %s329_s6, %s452_s5 }
 0x1d1   :  { %p335_p7 = pnand %p333_p6, %p330_p5 }
 0x1d3   :  { %338 = shalt.err (!%p335_p7)
}
 0x1d4   :  { %217 = dma.vmem_to_hbm [thread:$0]  %s215_s3, 128, %s452_s5, [#allocation3]  }
 0x1d5   :  { %339 = dma.done.wait [#allocation3], 128  }
 0x1d6   :  { %340 = vsyncadd [#allocation3], 4294967168 }
 0x1d7   :  { %221 = vsyncpa [#allocation3], 1 }

</bundles_post_ra>
